<compile_context>
chip_gen: v7x
topology: tpu7x:2x2x1
jax: 0.10.0
libtpu: 0.0.40
codegen_flags: <defaults>
</compile_context>

<pallas_src>
import math

import jax
import jax.numpy as jnp
from jax.experimental import pallas as pl
from jax.experimental.pallas import tpu as pltpu


def _discriminator_kernel(z_ref, r_ref, w1z_ref, w1r_ref, b1_ref,
                          w2_ref, b2_ref, w3_ref, b3_ref, o_ref):
    # Layer 1: z @ W1[:z_dim] (MXU, bf16 in / f32 acc) + r * W1[z_dim:] (VPU) + b1
    z = z_ref[...]                                                   # (bt, z_dim) bf16
    r = r_ref[...]                                                   # (bt, 1)     f32
    h1 = jnp.dot(z, w1z_ref[...], preferred_element_type=jnp.float32)
    h1 = h1 + r * w1r_ref[...].astype(jnp.float32) + b1_ref[...]
    h1 = jnp.maximum(h1, 0.0)                                        # ReLU

    # Layer 2: (bt,512) @ (512,512), bf16 operands, f32 accumulation
    h2 = jnp.dot(h1.astype(jnp.bfloat16), w2_ref[...],
                 preferred_element_type=jnp.float32) + b2_ref[...]
    h2 = jnp.maximum(h2, 0.0)                                        # ReLU

    # Layer 3 (N=1): VPU multiply + cross-lane reduce instead of a degenerate MXU matmul
    w3 = w3_ref[...].astype(jnp.float32)                             # (1, 512)
    logits = jnp.sum(h2 * w3, axis=-1, keepdims=True) + b3_ref[...]  # (bt, 1)
    o_ref[...] = jax.nn.sigmoid(logits)                              # Sigmoid (EUP)


def discriminator_forward(r, z, params, *, block_b=1024):
    """Pallas forward pass. r: (B, 1), z: (B, z_dim) -> (B, 1) float32."""
    w1z, w1r, b1, w2, b2, w3, b3 = params
    B, z_dim = z.shape

    z = z.astype(jnp.bfloat16)
    r = r.astype(jnp.float32)

    # Batch tile: one tile for small B; multiple-of-8-row tiles sharded across cores for
    # large B.
    bt = min(block_b, B)
    bt = max(8, ((bt + 7) // 8) * 8)
    Bp = ((B + bt - 1) // bt) * bt
    if Bp != B:
        z = jnp.pad(z, ((0, Bp - B), (0, 0)))
        r = jnp.pad(r, ((0, Bp - B), (0, 0)))
    grid = (Bp // bt,)

    # Weights/biases: full blocks with constant index_map -> fetched once, stay VMEM-resident.
    const = lambda a: pl.BlockSpec(a.shape, lambda i: (0,) * a.ndim)

    weight_bytes = sum(int(p.size) * p.dtype.itemsize for p in params)
    cost = pl.CostEstimate(
        flops=2 * Bp * (z_dim * 512 + 512 * 512 + 512),
        transcendentals=Bp,
        bytes_accessed=weight_bytes + Bp * (2 * z_dim + 4 + 4),
    )

    out = pl.pallas_call(
        _discriminator_kernel,
        out_shape=jax.ShapeDtypeStruct((Bp, 1), jnp.float32),
        grid=grid,
        in_specs=[
            pl.BlockSpec((bt, z_dim), lambda i: (i, 0)),   # z  (batch-tiled)
            pl.BlockSpec((bt, 1), lambda i: (i, 0)),       # r  (batch-tiled)
            const(w1z), const(w1r), const(b1),
            const(w2), const(b2),
            const(w3), const(b3),
        ],
        out_specs=pl.BlockSpec((bt, 1), lambda i: (i, 0)),
        compiler_params=pltpu.CompilerParams(dimension_semantics=("parallel",)),
        cost_estimate=cost,
    )(z, r, w1z, w1r, b1, w2, b2, w3, b3)

    return out[:B]


def init_discriminator_params(key, z_dim=10):
    """kaiming_normal (fan_in, gain=sqrt(2)) weights, zero biases (matches kaiming_init).

    Weights are stored as (in_features, out_features) bf16; W1 split at row z_dim,
    W3 stored as a (1, 512) row for the VPU reduction path. Biases stay f32.
    """
    dims = [(z_dim + 1, 512), (512, 512), (512, 1)]
    keys = jax.random.split(key, len(dims))
    raw = []
    for k, (fan_in, fan_out) in zip(keys, dims):
        std = math.sqrt(2.0) / math.sqrt(fan_in)
        raw.append(jax.random.normal(k, (fan_in, fan_out), dtype=jnp.float32) * std)
    w1, w2, w3 = raw

    w1z = w1[:z_dim].astype(jnp.bfloat16)          # (z_dim, 512)
    w1r = w1[z_dim:].astype(jnp.bfloat16)          # (1, 512)
    b1 = jnp.zeros((1, 512), jnp.float32)
    w2b = w2.astype(jnp.bfloat16)                  # (512, 512)
    b2 = jnp.zeros((1, 512), jnp.float32)
    w3b = w3.T.astype(jnp.bfloat16)                # (1, 512)
    b3 = jnp.zeros((1, 1), jnp.float32)
    return (w1z, w1r, b1, w2b, b2, w3b, b3)


def _reference_forward(r, z, params):
    """Pure-JAX f32 reference using the same (bf16-stored) parameters."""
    w1z, w1r, b1, w2, b2, w3, b3 = params
    w1 = jnp.concatenate([w1z, w1r], axis=0).astype(jnp.float32)
    x = jnp.concatenate([z, r], axis=1).astype(jnp.float32)
    h1 = jnp.maximum(x @ w1 + b1, 0.0)
    h2 = jnp.maximum(h1 @ w2.astype(jnp.float32) + b2, 0.0)
    return jax.nn.sigmoid(h2 @ w3.astype(jnp.float32).T + b3)


if __name__ == "__main__":
    z_dim = 10
    batch = 8

    key = jax.random.PRNGKey(0)
    k_params, k_r, k_z = jax.random.split(key, 3)

    params = init_discriminator_params(k_params, z_dim=z_dim)
    r = jax.random.normal(k_r, (batch, 1), dtype=jnp.float32)
    z = jax.random.normal(k_z, (batch, z_dim), dtype=jnp.float32)

    # Single-tile path (small batch).
    out = discriminator_forward(r, z, params)
    out = jax.block_until_ready(out)
    ref = _reference_forward(r, z, params)
    assert out.shape == (batch, 1)
    # bf16 weights/activations in the kernel vs f32 reference: loose tolerance.
    assert jnp.allclose(out, ref, atol=2e-2, rtol=2e-2), float(jnp.max(jnp.abs(out - ref)))

    # Multi-tile path (exercises the parallel grid + padding of a non-multiple batch).
    batch2 = 20
    k_r2, k_z2 = jax.random.split(jax.random.PRNGKey(1))
    r2 = jax.random.normal(k_r2, (batch2, 1), dtype=jnp.float32)
    z2 = jax.random.normal(k_z2, (batch2, z_dim), dtype=jnp.float32)
    out2 = jax.block_until_ready(discriminator_forward(r2, z2, params, block_b=8))
    ref2 = _reference_forward(r2, z2, params)
    assert out2.shape == (batch2, 1)
    assert jnp.allclose(out2, ref2, atol=2e-2, rtol=2e-2), float(jnp.max(jnp.abs(out2 - ref2)))

    print("KERNEL_OK")
</pallas_src>

<mosaic_0001>
module attributes {stable_mosaic.version = 11 : i64} {
  func.func @_discriminator_kernel(%arg0: i32, %arg1: memref<8x10xbf16, #tpu.memory_space<vmem>>, %arg2: memref<8x1xf32, #tpu.memory_space<vmem>>, %arg3: memref<10x512xbf16, #tpu.memory_space<vmem>>, %arg4: memref<1x512xbf16, #tpu.memory_space<vmem>>, %arg5: memref<1x512xf32, #tpu.memory_space<vmem>>, %arg6: memref<512x512xbf16, #tpu.memory_space<vmem>>, %arg7: memref<1x512xf32, #tpu.memory_space<vmem>>, %arg8: memref<1x512xbf16, #tpu.memory_space<vmem>>, %arg9: memref<1x1xf32, #tpu.memory_space<vmem>>, %arg10: memref<8x1xf32, #tpu.memory_space<vmem>>) attributes {dimension_semantics = [#tpu.dimension_semantics<parallel>], iteration_bounds = array<i64: 1>, scalar_prefetch = 0 : i64, scratch_operands = 0 : i64, tpu.core_type = #tpu.core_type<tc>, window_params = [{transform_indices = @transform_0, window_bounds = array<i64: 8, 10>}, {transform_indices = @transform_1, window_bounds = array<i64: 8, 1>}, {pipeline_mode = #tpu.pipeline_mode<synchronous>, transform_indices = @transform_2, window_bounds = array<i64: 10, 512>}, {pipeline_mode = #tpu.pipeline_mode<synchronous>, transform_indices = @transform_3, window_bounds = array<i64: 1, 512>}, {pipeline_mode = #tpu.pipeline_mode<synchronous>, transform_indices = @transform_4, window_bounds = array<i64: 1, 512>}, {pipeline_mode = #tpu.pipeline_mode<synchronous>, transform_indices = @transform_5, window_bounds = array<i64: 512, 512>}, {pipeline_mode = #tpu.pipeline_mode<synchronous>, transform_indices = @transform_6, window_bounds = array<i64: 1, 512>}, {pipeline_mode = #tpu.pipeline_mode<synchronous>, transform_indices = @transform_7, window_bounds = array<i64: 1, 512>}, {pipeline_mode = #tpu.pipeline_mode<synchronous>, transform_indices = @transform_8, window_bounds = array<i64: 1, 1>}, {transform_indices = @transform_9, window_bounds = array<i64: 8, 1>}]} {
    %c0 = arith.constant 0 : index
    %c0_0 = arith.constant 0 : index
    %0 = vector.load %arg1[%c0, %c0_0] : memref<8x10xbf16, #tpu.memory_space<vmem>>, vector<8x10xbf16>
    %c0_1 = arith.constant 0 : index
    %c0_2 = arith.constant 0 : index
    %1 = vector.load %arg2[%c0_1, %c0_2] : memref<8x1xf32, #tpu.memory_space<vmem>>, vector<8x1xf32>
    %c0_3 = arith.constant 0 : index
    %c0_4 = arith.constant 0 : index
    %2 = vector.load %arg3[%c0_3, %c0_4] : memref<10x512xbf16, #tpu.memory_space<vmem>>, vector<10x512xbf16>
    %cst = arith.constant dense<0.000000e+00> : vector<8x512xf32>
    %3 = tpu.matmul %0, %2, %cst {dimension_numbers = #tpu.dot_dimension_numbers<[1], [0], [0], [1], [0, 0, 1, 1], [], []>} : vector<8x10xbf16>, vector<10x512xbf16>, vector<8x512xf32> -> vector<8x512xf32>
    %c0_5 = arith.constant 0 : index
    %c0_6 = arith.constant 0 : index
    %4 = vector.load %arg4[%c0_5, %c0_6] : memref<1x512xbf16, #tpu.memory_space<vmem>>, vector<1x512xbf16>
    %5 = arith.extf %4 : vector<1x512xbf16> to vector<1x512xf32>
    %6 = vector.broadcast %1 : vector<8x1xf32> to vector<8x512xf32>
    %7 = vector.broadcast %5 : vector<1x512xf32> to vector<8x512xf32>
    %8 = arith.mulf %6, %7 : vector<8x512xf32>
    %9 = arith.addf %3, %8 : vector<8x512xf32>
    %c0_7 = arith.constant 0 : index
    %c0_8 = arith.constant 0 : index
    %10 = vector.load %arg5[%c0_7, %c0_8] : memref<1x512xf32, #tpu.memory_space<vmem>>, vector<1x512xf32>
    %11 = vector.broadcast %10 : vector<1x512xf32> to vector<8x512xf32>
    %12 = arith.addf %9, %11 : vector<8x512xf32>
    %cst_9 = arith.constant 0.000000e+00 : f32
    %13 = vector.broadcast %cst_9 : f32 to vector<8x512xf32>
    %14 = arith.maximumf %12, %13 : vector<8x512xf32>
    %15 = arith.truncf %14 : vector<8x512xf32> to vector<8x512xbf16>
    %c0_10 = arith.constant 0 : index
    %c0_11 = arith.constant 0 : index
    %16 = vector.load %arg6[%c0_10, %c0_11] : memref<512x512xbf16, #tpu.memory_space<vmem>>, vector<512x512xbf16>
    %cst_12 = arith.constant dense<0.000000e+00> : vector<8x512xf32>
    %17 = tpu.matmul %15, %16, %cst_12 {dimension_numbers = #tpu.dot_dimension_numbers<[1], [0], [0], [1], [0, 0, 1, 1], [], []>} : vector<8x512xbf16>, vector<512x512xbf16>, vector<8x512xf32> -> vector<8x512xf32>
    %c0_13 = arith.constant 0 : index
    %c0_14 = arith.constant 0 : index
    %18 = vector.load %arg7[%c0_13, %c0_14] : memref<1x512xf32, #tpu.memory_space<vmem>>, vector<1x512xf32>
    %19 = vector.broadcast %18 : vector<1x512xf32> to vector<8x512xf32>
    %20 = arith.addf %17, %19 : vector<8x512xf32>
    %cst_15 = arith.constant 0.000000e+00 : f32
    %21 = vector.broadcast %cst_15 : f32 to vector<8x512xf32>
    %22 = arith.maximumf %20, %21 : vector<8x512xf32>
    %c0_16 = arith.constant 0 : index
    %c0_17 = arith.constant 0 : index
    %23 = vector.load %arg8[%c0_16, %c0_17] : memref<1x512xbf16, #tpu.memory_space<vmem>>, vector<1x512xbf16>
    %24 = arith.extf %23 : vector<1x512xbf16> to vector<1x512xf32>
    %25 = vector.broadcast %24 : vector<1x512xf32> to vector<8x512xf32>
    %26 = arith.mulf %22, %25 : vector<8x512xf32>
    %cst_18 = arith.constant dense<0.000000e+00> : vector<8xf32>
    %27 = vector.multi_reduction <add>, %26, %cst_18 [1] : vector<8x512xf32> to vector<8xf32>
    %28 = vector.shape_cast %27 : vector<8xf32> to vector<8x1xf32>
    %c0_19 = arith.constant 0 : index
    %c0_20 = arith.constant 0 : index
    %29 = vector.load %arg9[%c0_19, %c0_20] : memref<1x1xf32, #tpu.memory_space<vmem>>, vector<1x1xf32>
    %30 = vector.broadcast %29 : vector<1x1xf32> to vector<8x1xf32>
    %31 = arith.addf %28, %30 : vector<8x1xf32>
    %32 = arith.negf %31 : vector<8x1xf32>
    %33 = math.exp %32 : vector<8x1xf32>
    %cst_21 = arith.constant 1.000000e+00 : f32
    %34 = vector.broadcast %cst_21 : f32 to vector<8x1xf32>
    %35 = arith.addf %34, %33 : vector<8x1xf32>
    %36 = arith.divf %34, %35 : vector<8x1xf32>
    %c0_22 = arith.constant 0 : index
    %c0_23 = arith.constant 0 : index
    %37 = vector.load %arg10[%c0_22, %c0_23] : memref<8x1xf32, #tpu.memory_space<vmem>>, vector<8x1xf32>
    tpu.vector_store %arg10[%c0_22, %c0_23], %36 {strides = array<i32>} : memref<8x1xf32, #tpu.memory_space<vmem>>, vector<8x1xf32>,
    return
  }
  func.func @transform_0(%arg0: i32) -> (i32, i32) {
    %c0_i32 = arith.constant 0 : i32
    %c0_i32_0 = arith.constant 0 : i32
    return %arg0, %c0_i32 : i32, i32
  }
  func.func @transform_1(%arg0: i32) -> (i32, i32) {
    %c0_i32 = arith.constant 0 : i32
    %c0_i32_0 = arith.constant 0 : i32
    return %arg0, %c0_i32 : i32, i32
  }
  func.func @transform_2(%arg0: i32) -> (i32, i32) {
    %c0_i32 = arith.constant 0 : i32
    %c0_i32_0 = arith.constant 0 : i32
    %c0_i32_1 = arith.constant 0 : i32
    return %c0_i32, %c0_i32_0 : i32, i32
  }
  func.func @transform_3(%arg0: i32) -> (i32, i32) {
    %c0_i32 = arith.constant 0 : i32
    %c0_i32_0 = arith.constant 0 : i32
    %c0_i32_1 = arith.constant 0 : i32
    return %c0_i32, %c0_i32_0 : i32, i32
  }
  func.func @transform_4(%arg0: i32) -> (i32, i32) {
    %c0_i32 = arith.constant 0 : i32
    %c0_i32_0 = arith.constant 0 : i32
    %c0_i32_1 = arith.constant 0 : i32
    return %c0_i32, %c0_i32_0 : i32, i32
  }
  func.func @transform_5(%arg0: i32) -> (i32, i32) {
    %c0_i32 = arith.constant 0 : i32
    %c0_i32_0 = arith.constant 0 : i32
    %c0_i32_1 = arith.constant 0 : i32
    return %c0_i32, %c0_i32_0 : i32, i32
  }
  func.func @transform_6(%arg0: i32) -> (i32, i32) {
    %c0_i32 = arith.constant 0 : i32
    %c0_i32_0 = arith.constant 0 : i32
    %c0_i32_1 = arith.constant 0 : i32
    return %c0_i32, %c0_i32_0 : i32, i32
  }
  func.func @transform_7(%arg0: i32) -> (i32, i32) {
    %c0_i32 = arith.constant 0 : i32
    %c0_i32_0 = arith.constant 0 : i32
    %c0_i32_1 = arith.constant 0 : i32
    return %c0_i32, %c0_i32_0 : i32, i32
  }
  func.func @transform_8(%arg0: i32) -> (i32, i32) {
    %c0_i32 = arith.constant 0 : i32
    %c0_i32_0 = arith.constant 0 : i32
    %c0_i32_1 = arith.constant 0 : i32
    return %c0_i32, %c0_i32_0 : i32, i32
  }
  func.func @transform_9(%arg0: i32) -> (i32, i32) {
    %c0_i32 = arith.constant 0 : i32
    %c0_i32_0 = arith.constant 0 : i32
    return %arg0, %c0_i32 : i32, i32
  }
}

</mosaic_0001>

<bundles_post_ra>
// kernel: tpu_custom_call.1
= control target key start
LH: loop header
LB: loop body
LE: loop exit
PB: predicated region body
PF: predicated region fallthrough
CT: control target
= control target key end

     0   :  { %s1850_s0 = inlined_call_operand.vmem [shape: bf16[8,10], index: 0, kind: input, shape index: {}]   ;;  %s1851_s1 = inlined_call_operand.vmem [shape: f32[8,1], index: 1, kind: input, shape index: {}]   ;;  %s1852_s2 = inlined_call_operand.hbm [shape: bf16[10,512], index: 2, kind: input, shape index: {}]   ;;  %s1853_s3 = inlined_call_operand.vmem [shape: bf16[1,512], index: 3, kind: input, shape index: {}]   ;;  %s1854_s4 = inlined_call_operand.vmem [shape: f32[1,512], index: 4, kind: input, shape index: {}]   ;;  %s1855_s5 = inlined_call_operand.hbm [shape: bf16[512,512], index: 5, kind: input, shape index: {}]   ;;  %s1856_s6 = inlined_call_operand.vmem [shape: f32[1,512], index: 6, kind: input, shape index: {}]   ;;  %s1857_s7 = inlined_call_operand.vmem [shape: bf16[1,512], index: 7, kind: input, shape index: {}]   ;;  %s1858_s8 = inlined_call_operand.<no memory space> [shape: f32[1,1], index: 8, kind: input, shape index: {}]   ;;  %s1859_s9 = inlined_call_operand.vmem [shape: f32[8,1], index: 9, kind: output, shape index: {}]  }
   0x1   :  { %v14_v0 = vstv %s1858_s8 }
   0x2   :  { %15 = vst [vmem:[#allocation2] sm:$0x1] %v14_v0 }
   0x3   :  { %16 = vsyncpa [#allocation4], 0 }
   0x4   :  { %17 = vsyncpa [#allocation6], 0  ;;  %s1700_s11 = smov [#allocation3]   ;;  %s1652_s15 = scalar_lea.hbm %s1852_s2, 512 }
   0x5   :  { %s27_s12 = sshll.u32 %s1700_s11, 4  ;;  %p1653_p0 = scmp.ne.s32.totalorder %s1852_s2, %s1652_s15  ;;  %s28_s12 = int_to_ptr.vmem [resolvable:$true] %s27_s12 }
   0x6   :  { %p1656_p1 = scmp.lt.u32.totalorder %s1652_s15, %s1852_s2 }
   0x8   :  { %p1658_p2 = pnand %p1656_p1, %p1653_p0 }
   0xa   :  { %1661 = shalt.err (!%p1658_p2)
}
   0xb   :  { %s1662_s8 = scalar_lea.vmem %s28_s12, 512  ;;  %p1667_p4 = scmp.lt.s32.totalorder %s28_s12, %s28_s12 }
   0xc   :  { %p1663_p3 = scmp.ne.s32.totalorder %s28_s12, %s1662_s8  ;;  %p1668_p5 = scmp.lt.s32.totalorder %s1662_s8, %s1662_s8 }
   0xe   :  { %p1669_p6 = por %p1668_p5, %p1667_p4 }
  0x10   :  { %p1670_p7 = pnand %p1669_p6, %p1663_p3 }
  0x12   :  { %1673 = shalt.err (!%p1670_p7)
}
  0x13   :  { %s1701_s20 = smov 256   ;;  %s1702_s21 = smov 16  }
  0x14   :  { %33 = dma.hbm_to_vmem [thread:$0]  %s1852_s2, 512, %s28_s12, [#allocation4], %s1701_s20, %s1701_s20, %s1702_s21  }
  0x15   :  { %s1703_s24 = smov [#allocation5]   ;;  %s1674_s28 = scalar_lea.hbm %s1855_s5, 16384 }
  0x16   :  { %s43_s25 = sshll.u32 %s1703_s24, 4  ;;  %p1675_p8 = scmp.ne.s32.totalorder %s1855_s5, %s1674_s28  ;;  %s44_s25 = int_to_ptr.vmem [resolvable:$true] %s43_s25 }
  0x17   :  { %p1678_p9 = scmp.lt.u32.totalorder %s1674_s28, %s1855_s5 }
  0x19   :  { %p1680_p10 = pnand %p1678_p9, %p1675_p8 }
  0x1b   :  { %1683 = shalt.err (!%p1680_p10)
}
  0x1c   :  { %s1684_s13 = scalar_lea.vmem %s44_s25, 16384  ;;  %p1689_p12 = scmp.lt.s32.totalorder %s44_s25, %s44_s25 }
  0x1d   :  { %p1685_p11 = scmp.ne.s32.totalorder %s44_s25, %s1684_s13  ;;  %p1690_p13 = scmp.lt.s32.totalorder %s1684_s13, %s1684_s13 }
  0x1f   :  { %p1691_p0 = por %p1690_p13, %p1689_p12 }
  0x21   :  { %p1692_p1 = pnand %p1691_p0, %p1685_p11 }
  0x23   :  { %1695 = shalt.err (!%p1692_p1)
}
  0x24   :  { %49 = dma.hbm_to_vmem [thread:$0]  %s1855_s5, 16384, %s44_s25, [#allocation6], %s1701_s20, %s1701_s20, %s1702_s21  }
  0x25   :  { %1696 = dma.done.wait [#allocation4], 512  }
  0x26   :  { %1697 = vsyncadd [#allocation4], 4294966784 }
  0x27   :  { %1698 = dma.done.wait [#allocation6], 16384  }
  0x28   :  { %1699 = vsyncadd [#allocation6], 4294950912  ;;  %v1704_v1 = vmov 0   ;;  %vm137_vm0 = vcmask 1044480   ;;  %v63_v6 = vld [vmem:[%s1850_s0] sm:$0xf] }
  0x29   :  { %182 = vmatprep.mubr.bf16.mxu0 %v1704_v1  ;;  %223 = vmatprep.mubr.bf16.mxu1 %v1704_v1  ;;  %v1450_v2 = vld [vmem:[#allocation3 + $0x4] ss:$16 sps:$4 sm:$0x1f]   ;;  %v1452_v3 = vld [vmem:[#allocation3 + $0xc] ss:$16 sps:$4 sm:$0x1f]  }
  0x2a   :  { %1449 = vset.pattern.permute.xlu0 %v1704_v1  ;;  %1298 = vmatprep.subr.msk.bf16.mxu0 %vm137_vm0, %v1450_v2  ;;  %v1454_v4 = vld [vmem:[#allocation3] ss:$16 sps:$4 sm:$0x1f]   ;;  %v1455_v5 = vld [vmem:[#allocation3 + $0x8] ss:$16 sps:$4 sm:$0x1f]  }
  0x2b   :  { %1300 = vmatprep.subr.msk.bf16.mxu1 %vm137_vm0, %v1452_v3  ;;  %v64_v7 = vld [vmem:[%s1851_s1] sm:$0xff]  ;;  %v139_v8 = vsel %vm137_vm0, %v1454_v4, 0  ;;  %v145_v9 = vsel %vm137_vm0, %v1455_v5, 0  ;;  %vm133_vm1 = vcmask 80896   ;;  %v1459_v12 = vld [vmem:[#allocation5 + $0x8] ss:$16 sps:$4 sm:$0xff]  }
  0x2c   :  { %73 = vperm.xlu0 %1449, %v64_v7   ;;  %v1456_v10 = vld [vmem:[#allocation5] ss:$16 sps:$4 sm:$0xff]   ;;  %151 = vmatpush1.bf16.msra.mxu0 %v139_v8  ;;  %v1458_v11 = vld [vmem:[#allocation5 + $0x4] ss:$16 sps:$4 sm:$0xff]   ;;  %v1461_v13 = vld [vmem:[#allocation5 + $0xc] ss:$16 sps:$4 sm:$0xff]  }
  0x2d   :  { %192 = vmatpush1.bf16.msra.mxu1 %v145_v9  ;;  %1056 = vmatprep.subr.bf16.mxu0 %v1458_v11  ;;  %v1464_v14 = vld [vmem:[#allocation5 + $0x24] ss:$16 sps:$4 sm:$0xff]   ;;  %v1462_v15 = vld [vmem:[#allocation5 + $0x20] ss:$16 sps:$4 sm:$0xff]   ;;  %v1467_v16 = vld [vmem:[#allocation5 + $0x2c] ss:$16 sps:$4 sm:$0xff]  }
  0x2e   :  { %1138 = vmatprep.subr.bf16.mxu1 %v1461_v13  ;;  %v1465_v17 = vld [vmem:[#allocation5 + $0x28] ss:$16 sps:$4 sm:$0xff]   ;;  %v1470_v18 = vld [vmem:[#allocation5 + $0x44] ss:$16 sps:$4 sm:$0xff]   ;;  %v1473_v19 = vld [vmem:[#allocation5 + $0x4c] ss:$16 sps:$4 sm:$0xff]  }
  0x2f   :  { %1299 = vmatmul.mubr.msk.bf16.vlgmr.msra.gmra.mrb[0].mxu0 %vm133_vm1, %v63_v6  ;;  %v1468_v20 = vld [vmem:[#allocation5 + $0x40] ss:$16 sps:$4 sm:$0xff]   ;;  %v1471_v21 = vld [vmem:[#allocation5 + $0x48] ss:$16 sps:$4 sm:$0xff]   ;;  %v1476_v22 = vld [vmem:[#allocation5 + $0x64] ss:$16 sps:$4 sm:$0xff]  }
  0x30   :  { %1301 = vmatmul.mubr.msk.bf16.vlgmr.msra.gmra.mrb[0].mxu1 %vm133_vm1, %v63_v6  ;;  %1057 = vmatpush1.bf16.msra.mxu0 %v1456_v10  ;;  %v1479_v23 = vld [vmem:[#allocation5 + $0x6c] ss:$16 sps:$4 sm:$0xff]   ;;  %v1474_v24 = vld [vmem:[#allocation5 + $0x60] ss:$16 sps:$4 sm:$0xff]   ;;  %v1477_v25 = vld [vmem:[#allocation5 + $0x68] ss:$16 sps:$4 sm:$0xff]  }
  0x31   :  { %1139 = vmatpush1.bf16.msra.mxu1 %v1459_v12  ;;  %1058 = vmatprep.subr.bf16.mxu0 %v1464_v14  ;;  %v1482_v26 = vld [vmem:[#allocation5 + $0x84] ss:$16 sps:$4 sm:$0xff]   ;;  %v1485_v27 = vld [vmem:[#allocation5 + $0x8c] ss:$16 sps:$4 sm:$0xff]   ;;  %v1480_v28 = vld [vmem:[#allocation5 + $0x80] ss:$16 sps:$4 sm:$0xff]   ;;  %v77_v12 = vlaneseq }
  0x32   :  { %1140 = vmatprep.subr.bf16.mxu1 %v1467_v16  ;;  %v1483_v29 = vld [vmem:[#allocation5 + $0x88] ss:$16 sps:$4 sm:$0xff]   ;;  %v1488_v30 = vld [vmem:[#allocation5 + $0xa4] ss:$16 sps:$4 sm:$0xff]   ;;  %v1491_v31 = vld [vmem:[#allocation5 + $0xac] ss:$16 sps:$4 sm:$0xff]  }
  0x33   :  { %v1486_v32 = vld [vmem:[#allocation5 + $0xa0] ss:$16 sps:$4 sm:$0xff]   ;;  %v1489_v33 = vld [vmem:[#allocation5 + $0xa8] ss:$16 sps:$4 sm:$0xff]   ;;  %v1494_v34 = vld [vmem:[#allocation5 + $0xc4] ss:$16 sps:$4 sm:$0xff]  }
  0x34   :  { %1059 = vmatpush1.bf16.msra.mxu0 %v1462_v15  ;;  %v1497_v35 = vld [vmem:[#allocation5 + $0xcc] ss:$16 sps:$4 sm:$0xff]   ;;  %v1492_v36 = vld [vmem:[#allocation5 + $0xc0] ss:$16 sps:$4 sm:$0xff]   ;;  %v1495_v37 = vld [vmem:[#allocation5 + $0xc8] ss:$16 sps:$4 sm:$0xff]  }
  0x35   :  { %1141 = vmatpush1.bf16.msra.mxu1 %v1465_v17  ;;  %1060 = vmatprep.subr.bf16.mxu0 %v1470_v18  ;;  %v1500_v38 = vld [vmem:[#allocation5 + $0xe4] ss:$16 sps:$4 sm:$0xff]   ;;  %v1503_v39 = vld [vmem:[#allocation5 + $0xec] ss:$16 sps:$4 sm:$0xff]   ;;  %v1498_v40 = vld [vmem:[#allocation5 + $0xe0] ss:$16 sps:$4 sm:$0xff]  }
  0x36   :  { %1142 = vmatprep.subr.bf16.mxu1 %v1473_v19  ;;  %v1501_v41 = vld [vmem:[#allocation5 + $0xe8] ss:$16 sps:$4 sm:$0xff]   ;;  %v1506_v42 = vld [vmem:[#allocation5 + $0x104] ss:$16 sps:$4 sm:$0xff]   ;;  %v1509_v43 = vld [vmem:[#allocation5 + $0x10c] ss:$16 sps:$4 sm:$0xff]  }
  0x37   :  { %v1504_v44 = vld [vmem:[#allocation5 + $0x100] ss:$16 sps:$4 sm:$0xff]   ;;  %v1507_v45 = vld [vmem:[#allocation5 + $0x108] ss:$16 sps:$4 sm:$0xff]   ;;  %v1512_v46 = vld [vmem:[#allocation5 + $0x124] ss:$16 sps:$4 sm:$0xff]  }
  0x38   :  { %1061 = vmatpush1.bf16.msra.mxu0 %v1468_v20  ;;  %v1510_v47 = vld [vmem:[#allocation5 + $0x120] ss:$16 sps:$4 sm:$0xff]   ;;  %v1515_v48 = vld [vmem:[#allocation5 + $0x12c] ss:$16 sps:$4 sm:$0xff]   ;;  %v1513_v49 = vld [vmem:[#allocation5 + $0x128] ss:$16 sps:$4 sm:$0xff]  }
  0x39   :  { %1143 = vmatpush1.bf16.msra.mxu1 %v1471_v21  ;;  %1062 = vmatprep.subr.bf16.mxu0 %v1476_v22  ;;  %v1518_v50 = vld [vmem:[#allocation5 + $0x144] ss:$16 sps:$4 sm:$0xff]   ;;  %v1521_v51 = vld [vmem:[#allocation5 + $0x14c] ss:$16 sps:$4 sm:$0xff]   ;;  %v1516_v52 = vld [vmem:[#allocation5 + $0x140] ss:$16 sps:$4 sm:$0xff]  }
  0x3a   :  { %1144 = vmatprep.subr.bf16.mxu1 %v1479_v23  ;;  %v1519_v53 = vld [vmem:[#allocation5 + $0x148] ss:$16 sps:$4 sm:$0xff]   ;;  %v1524_v54 = vld [vmem:[#allocation5 + $0x164] ss:$16 sps:$4 sm:$0xff]   ;;  %v1527_v55 = vld [vmem:[#allocation5 + $0x16c] ss:$16 sps:$4 sm:$0xff]  }
  0x3b   :  { %v1522_v56 = vld [vmem:[#allocation5 + $0x160] ss:$16 sps:$4 sm:$0xff]   ;;  %v1525_v57 = vld [vmem:[#allocation5 + $0x168] ss:$16 sps:$4 sm:$0xff]   ;;  %v1530_v58 = vld [vmem:[#allocation5 + $0x184] ss:$16 sps:$4 sm:$0xff]  }
  0x3c   :  { %1063 = vmatpush1.bf16.msra.mxu0 %v1474_v24  ;;  %v1533_v59 = vld [vmem:[#allocation5 + $0x18c] ss:$16 sps:$4 sm:$0xff]   ;;  %v1528_v60 = vld [vmem:[#allocation5 + $0x180] ss:$16 sps:$4 sm:$0xff]   ;;  %v1531_v61 = vld [vmem:[#allocation5 + $0x188] ss:$16 sps:$4 sm:$0xff]  }
  0x3d   :  { %1145 = vmatpush1.bf16.msra.mxu1 %v1477_v25  ;;  %1064 = vmatprep.subr.bf16.mxu0 %v1482_v26  ;;  %v1536_v62 = vld [vmem:[#allocation5 + $0x1a4] ss:$16 sps:$4 sm:$0xff]   ;;  %v1539_v63 = vld [vmem:[#allocation5 + $0x1ac] ss:$16 sps:$4 sm:$0xff]   ;;  %v1534_v0 = vld [vmem:[#allocation5 + $0x1a0] ss:$16 sps:$4 sm:$0xff]  }
  0x3e   :  { %1146 = vmatprep.subr.bf16.mxu1 %v1485_v27  ;;  %v1537_v1 = vld [vmem:[#allocation5 + $0x1a8] ss:$16 sps:$4 sm:$0xff]   ;;  %v1542_v2 = vld [vmem:[#allocation5 + $0x1c4] ss:$16 sps:$4 sm:$0xff]   ;;  %v1540_v3 = vld [vmem:[#allocation5 + $0x1c0] ss:$16 sps:$4 sm:$0xff]  }
  0x3f   :  { %v1543_v4 = vld [vmem:[#allocation5 + $0x1c8] ss:$16 sps:$4 sm:$0xff]   ;;  %v1545_v5 = vld [vmem:[#allocation5 + $0x1cc] ss:$16 sps:$4 sm:$0xff]   ;;  %v1548_v6 = vld [vmem:[#allocation5 + $0x1e4] ss:$16 sps:$4 sm:$0xff]  }
  0x40   :  { %1065 = vmatpush1.bf16.msra.mxu0 %v1480_v28  ;;  %v1551_v7 = vld [vmem:[#allocation5 + $0x1ec] ss:$16 sps:$4 sm:$0xff]   ;;  %v1546_v8 = vld [vmem:[#allocation5 + $0x1e0] ss:$16 sps:$4 sm:$0xff]   ;;  %v1549_v9 = vld [vmem:[#allocation5 + $0x1e8] ss:$16 sps:$4 sm:$0xff]  }
  0x41   :  { %1147 = vmatpush1.bf16.msra.mxu1 %v1483_v29  ;;  %1066 = vmatprep.subr.bf16.mxu0 %v1488_v30  ;;  %v1554_v10 = vld [vmem:[#allocation5 + $0x204] ss:$16 sps:$4 sm:$0xff]   ;;  %v1557_v11 = vld [vmem:[#allocation5 + $0x20c] ss:$16 sps:$4 sm:$0xff]   ;;  %v1788_v13 = vshrl.u32 %v77_v12, 7  ;;  %vm1286_vm2 = vcmask 7168  }
  0x42   :  { %1148 = vmatprep.subr.bf16.mxu1 %v1491_v31  ;;  %v69_v14 = vld [vmem:[%s1853_s3] sm:$0xf]  ;;  %v1578_v12 = vld [vmem:[#allocation5 + $0x284] ss:$16 sps:$4 sm:$0xff]  }
  0x43   :  { %v70_v15 = vunpack.c.l.bf16 %v69_v14  ;;  %v1794_v16 = vsub.s32 0, %v1788_v13  ;;  %v87_v17 = vsub.s32 4, %v1788_v13  ;;  %v1798_v18 = vsub.s32 2, %v1788_v13  ;;  %v232_v29 = vld [vmem:[%s1854_s4] sm:$0xf] }
  0x44   :  { %1067 = vmatpush1.bf16.msra.mxu0 %v1486_v32  ;;  %v91_v19 = vsub.s32 6, %v1788_v13  ;;  %v240_v30 = vsub.s32 1, %v1788_v13  ;;  %v248_v31 = vsub.s32 3, %v1788_v13  ;;  %v1581_v14 = vld [vmem:[#allocation5 + $0x28c] ss:$16 sps:$4 sm:$0xff]  }
  0x45   :  { %1149 = vmatpush1.bf16.msra.mxu1 %v1489_v33  ;;  %1068 = vmatprep.subr.bf16.mxu0 %v1494_v34  ;;  %v80_v20 = vrot.slane %v70_v15, %v1794_v16  ;;  %v88_v21 = vrot.slane %v70_v15, %v87_v17  ;;  %v84_v22 = vrot.slane %v70_v15, %v1798_v18 }
  0x46   :  { %1150 = vmatprep.subr.bf16.mxu1 %v1497_v35  ;;  %v92_v23 = vrot.slane %v70_v15, %v91_v19  ;;  %v1576_v15 = vld [vmem:[#allocation5 + $0x280] ss:$16 sps:$4 sm:$0xff]  }
  0x47   :  { %v100_v24 = vrot.slane %v80_v20, %v1794_v16  ;;  %v108_v25 = vrot.slane %v88_v21, %v1794_v16  ;;  %v104_v27 = vrot.slane %v84_v22, %v1794_v16  ;;  %v1579_v20 = vld [vmem:[#allocation5 + $0x288] ss:$16 sps:$4 sm:$0xff]   ;;  %v1584_v21 = vld [vmem:[#allocation5 + $0x2a4] ss:$16 sps:$4 sm:$0xff]   ;;  %v1587_v22 = vld [vmem:[#allocation5 + $0x2ac] ss:$16 sps:$4 sm:$0xff]  }
  0x48   :  { %1069 = vmatpush1.bf16.msra.mxu0 %v1492_v36  ;;  %v112_v28 = vrot.slane %v92_v23, %v1794_v16  ;;  %v237_v36 = vrot.slane %v232_v29, %v1794_v16  ;;  %v1582_v23 = vld [vmem:[#allocation5 + $0x2a0] ss:$16 sps:$4 sm:$0xff]  }
  0x49   :  { %1151 = vmatpush1.bf16.msra.mxu1 %v1495_v37  ;;  %1070 = vmatprep.subr.bf16.mxu0 %v1500_v38  ;;  %v245_v37 = vrot.slane %v232_v29, %v1798_v18 }
  0x4a   :  { %1152 = vmatprep.subr.bf16.mxu1 %v1503_v39 }
  0x4c   :  { %1071 = vmatpush1.bf16.msra.mxu0 %v1498_v40  ;;  %v241_v40 = vrot.slane %v232_v29, %v240_v30 }
  0x4d   :  { %1153 = vmatpush1.bf16.msra.mxu1 %v1501_v41  ;;  %1072 = vmatprep.subr.bf16.mxu0 %v1506_v42  ;;  %v249_v41 = vrot.slane %v232_v29, %v248_v31  ;;  %v1596_v29 = vld [vmem:[#allocation5 + $0x2e4] ss:$16 sps:$4 sm:$0xff]  }
  0x4e   :  { %1154 = vmatprep.subr.bf16.mxu1 %v1509_v43 }
  0x50   :  { %1073 = vmatpush1.bf16.msra.mxu0 %v1504_v44 }
  0x51   :  { %1155 = vmatpush1.bf16.msra.mxu1 %v1507_v45  ;;  %1074 = vmatprep.subr.bf16.mxu0 %v1512_v46 }
  0x52   :  { %1156 = vmatprep.subr.bf16.mxu1 %v1515_v48 }
  0x54   :  { %1075 = vmatpush1.bf16.msra.mxu0 %v1510_v47 }
  0x55   :  { %1157 = vmatpush1.bf16.msra.mxu1 %v1513_v49  ;;  %1076 = vmatprep.subr.bf16.mxu0 %v1518_v50 }
  0x56   :  { %1158 = vmatprep.subr.bf16.mxu1 %v1521_v51 }
  0x58   :  { %1077 = vmatpush1.bf16.msra.mxu0 %v1516_v52 }
  0x59   :  { %1159 = vmatpush1.bf16.msra.mxu1 %v1519_v53  ;;  %1078 = vmatprep.subr.bf16.mxu0 %v1524_v54 }
  0x5a   :  { %1160 = vmatprep.subr.bf16.mxu1 %v1527_v55 }
  0x5c   :  { %1079 = vmatpush1.bf16.msra.mxu0 %v1522_v56 }
  0x5d   :  { %1161 = vmatpush1.bf16.msra.mxu1 %v1525_v57  ;;  %1080 = vmatprep.subr.bf16.mxu0 %v1530_v58 }
  0x5e   :  { %1162 = vmatprep.subr.bf16.mxu1 %v1533_v59 }
  0x60   :  { %1081 = vmatpush1.bf16.msra.mxu0 %v1528_v60  ;;  %v1552_v60 = vld [vmem:[#allocation5 + $0x200] ss:$16 sps:$4 sm:$0xff]  }
  0x61   :  { %1163 = vmatpush1.bf16.msra.mxu1 %v1531_v61  ;;  %1082 = vmatprep.subr.bf16.mxu0 %v1536_v62  ;;  %v1555_v61 = vld [vmem:[#allocation5 + $0x208] ss:$16 sps:$4 sm:$0xff]  }
  0x62   :  { %1164 = vmatprep.subr.bf16.mxu1 %v1539_v63  ;;  %v1560_v63 = vld [vmem:[#allocation5 + $0x224] ss:$16 sps:$4 sm:$0xff]  }
  0x64   :  { %1083 = vmatpush1.bf16.msra.mxu0 %v1534_v0  ;;  %v1563_v0 = vld [vmem:[#allocation5 + $0x22c] ss:$16 sps:$4 sm:$0xff]  }
  0x65   :  { %1165 = vmatpush1.bf16.msra.mxu1 %v1537_v1  ;;  %1084 = vmatprep.subr.bf16.mxu0 %v1542_v2  ;;  %v1558_v2 = vld [vmem:[#allocation5 + $0x220] ss:$16 sps:$4 sm:$0xff]  }
  0x66   :  { %1166 = vmatprep.subr.bf16.mxu1 %v1545_v5  ;;  %v1569_v5 = vld [vmem:[#allocation5 + $0x24c] ss:$16 sps:$4 sm:$0xff]  }
  0x68   :  { %1085 = vmatpush1.bf16.msra.mxu0 %v1540_v3  ;;  %v1561_v3 = vld [vmem:[#allocation5 + $0x228] ss:$16 sps:$4 sm:$0xff]  }
  0x69   :  { %1167 = vmatpush1.bf16.msra.mxu1 %v1543_v4  ;;  %1086 = vmatprep.subr.bf16.mxu0 %v1548_v6  ;;  %v1566_v4 = vld [vmem:[#allocation5 + $0x244] ss:$16 sps:$4 sm:$0xff]   ;;  %v1564_v6 = vld [vmem:[#allocation5 + $0x240] ss:$16 sps:$4 sm:$0xff]  }
  0x6a   :  { %1168 = vmatprep.subr.bf16.mxu1 %v1551_v7  ;;  %v1567_v7 = vld [vmem:[#allocation5 + $0x248] ss:$16 sps:$4 sm:$0xff]  }
  0x6c   :  { %1087 = vmatpush1.bf16.msra.mxu0 %v1546_v8  ;;  %v1572_v8 = vld [vmem:[#allocation5 + $0x264] ss:$16 sps:$4 sm:$0xff]  }
  0x6d   :  { %1169 = vmatpush1.bf16.msra.mxu1 %v1549_v9  ;;  %1097 = vmatprep.subr.bf16.mxu0 %v1554_v10  ;;  %v1575_v9 = vld [vmem:[#allocation5 + $0x26c] ss:$16 sps:$4 sm:$0xff]   ;;  %v1570_v10 = vld [vmem:[#allocation5 + $0x260] ss:$16 sps:$4 sm:$0xff]  }
  0x6e   :  { %1179 = vmatprep.subr.bf16.mxu1 %v1557_v11  ;;  %v1573_v11 = vld [vmem:[#allocation5 + $0x268] ss:$16 sps:$4 sm:$0xff]  }
  0xab   :  { %v74_v26 = vpop.permute.xlu0 %73 }
  0xac   :  { %v113_v32 = vmul.f32 %v100_v24, %v74_v26  ;;  %v115_v33 = vmul.f32 %v108_v25, %v74_v26  ;;  %v114_v34 = vmul.f32 %v104_v27, %v74_v26  ;;  %v116_v35 = vmul.f32 %v112_v28, %v74_v26  ;;  %v1585_v24 = vld [vmem:[#allocation5 + $0x2a8] ss:$16 sps:$4 sm:$0xff]   ;;  %v1590_v25 = vld [vmem:[#allocation5 + $0x2c4] ss:$16 sps:$4 sm:$0xff]   ;;  %v1593_v26 = vld [vmem:[#allocation5 + $0x2cc] ss:$16 sps:$4 sm:$0xff]  }
  0xad   :  { %v1588_v27 = vld [vmem:[#allocation5 + $0x2c0] ss:$16 sps:$4 sm:$0xff]   ;;  %v1591_v28 = vld [vmem:[#allocation5 + $0x2c8] ss:$16 sps:$4 sm:$0xff]  }
 0x102   :  { %v184_v38 = vpop.f32.mrb[0].mxu0 }
 0x103   :  { %v225_v39 = vpop.f32.mrb[0].mxu1  ;;  %v185_v42 = vadd.f32 %v184_v38, %v113_v32  ;;  %v186_v44 = vpop.f32.mrb[1].mxu0  ;;  %v1599_v32 = vld [vmem:[#allocation5 + $0x2ec] ss:$16 sps:$4 sm:$0xff]   ;;  %v1603_v38 = vld [vmem:[#allocation5 + $0x308] ss:$16 sps:$4 sm:$0xff]  }
 0x104   :  { %v226_v43 = vadd.f32 %v225_v39, %v115_v33  ;;  %v227_v45 = vpop.f32.mrb[1].mxu1  ;;  %v187_v46 = vadd.f32 %v186_v44, %v114_v34  ;;  %v188_v48 = vpop.f32.mrb[2].mxu0  ;;  %v1594_v33 = vld [vmem:[#allocation5 + $0x2e0] ss:$16 sps:$4 sm:$0xff]   ;;  %v1597_v34 = vld [vmem:[#allocation5 + $0x2e8] ss:$16 sps:$4 sm:$0xff]  }
 0x105   :  { %v228_v47 = vadd.f32 %v227_v45, %v116_v35  ;;  %v229_v49 = vpop.f32.mrb[2].mxu1  ;;  %v254_v50 = vadd.f32 %v237_v36, %v185_v42  ;;  %v189_v52 = vpop.f32.mrb[3].mxu0  ;;  %v1602_v35 = vld [vmem:[#allocation5 + $0x304] ss:$16 sps:$4 sm:$0xff]   ;;  %v1605_v36 = vld [vmem:[#allocation5 + $0x30c] ss:$16 sps:$4 sm:$0xff]  }
 0x106   :  { %v1822_v51 = vadd.f32 %v245_v37, %v226_v43  ;;  %v230_v53 = vpop.f32.mrb[3].mxu1  ;;  %v255_v54 = vadd.f32 %v241_v40, %v187_v46  ;;  %v1600_v37 = vld [vmem:[#allocation5 + $0x300] ss:$16 sps:$4 sm:$0xff]   ;;  %v1608_v39 = vld [vmem:[#allocation5 + $0x324] ss:$16 sps:$4 sm:$0xff]  }
 0x107   :  { %v257_v55 = vadd.f32 %v249_v41, %v228_v47  ;;  %v258_v56 = vmax.f32 %v254_v50, 0.0  ;;  %v1611_v40 = vld [vmem:[#allocation5 + $0x32c] ss:$16 sps:$4 sm:$0xff]   ;;  %v1606_v41 = vld [vmem:[#allocation5 + $0x320] ss:$16 sps:$4 sm:$0xff]  }
 0x108   :  { %v259_v57 = vmax.f32 %v255_v54, 0.0  ;;  %v1609_v42 = vld [vmem:[#allocation5 + $0x328] ss:$16 sps:$4 sm:$0xff]   ;;  %v1614_v43 = vld [vmem:[#allocation5 + $0x344] ss:$16 sps:$4 sm:$0xff]  }
 0x109   :  { %v261_v58 = vmax.f32 %v257_v55, 0.0  ;;  %v262_v62 = vpack.c.bf16 %v258_v56, %v258_v56  ;;  %v1617_v44 = vld [vmem:[#allocation5 + $0x34c] ss:$16 sps:$4 sm:$0xff]   ;;  %v1612_v45 = vld [vmem:[#allocation5 + $0x340] ss:$16 sps:$4 sm:$0xff]  }
 0x10a   :  { %v263_v59 = vpack.c.bf16 %v259_v57, %v259_v57  ;;  %v1615_v46 = vld [vmem:[#allocation5 + $0x348] ss:$16 sps:$4 sm:$0xff]   ;;  %v1620_v47 = vld [vmem:[#allocation5 + $0x364] ss:$16 sps:$4 sm:$0xff]   ;;  %v1623_v48 = vld [vmem:[#allocation5 + $0x36c] ss:$16 sps:$4 sm:$0xff]  }
 0x10b   :  { %v265_v1 = vpack.c.bf16 %v261_v58, %v261_v58  ;;  %v1618_v49 = vld [vmem:[#allocation5 + $0x360] ss:$16 sps:$4 sm:$0xff]   ;;  %v1621_v50 = vld [vmem:[#allocation5 + $0x368] ss:$16 sps:$4 sm:$0xff]   ;;  %v1626_v52 = vld [vmem:[#allocation5 + $0x384] ss:$16 sps:$4 sm:$0xff]  }
 0x10c   :  { %1088 = vmatprep.mubr.bf16.mxu0 %v263_v59  ;;  %1170 = vmatprep.mubr.bf16.mxu1 %v263_v59  ;;  %v1629_v53 = vld [vmem:[#allocation5 + $0x38c] ss:$16 sps:$4 sm:$0xff]   ;;  %v1624_v54 = vld [vmem:[#allocation5 + $0x380] ss:$16 sps:$4 sm:$0xff]   ;;  %v1627_v55 = vld [vmem:[#allocation5 + $0x388] ss:$16 sps:$4 sm:$0xff]  }
 0x10d   :  { %1089 = vmatmul.mubr.bf16.vlgmr.msra.gmra.mrb[4].mxu0 %v262_v62  ;;  %1171 = vmatmul.mubr.bf16.vlgmr.msra.gmra.mrb[4].mxu1 %v262_v62  ;;  %v1632_v56 = vld [vmem:[#allocation5 + $0x3a4] ss:$16 sps:$4 sm:$0xff]   ;;  %v1635_v57 = vld [vmem:[#allocation5 + $0x3ac] ss:$16 sps:$4 sm:$0xff]   ;;  %v1630_v58 = vld [vmem:[#allocation5 + $0x3a0] ss:$16 sps:$4 sm:$0xff]  }
 0x10e   :  { %1098 = vmatpush1.bf16.msra.mxu0 %v1552_v60  ;;  %1180 = vmatpush1.bf16.msra.mxu1 %v1555_v61  ;;  %v1633_v59 = vld [vmem:[#allocation5 + $0x3a8] ss:$16 sps:$4 sm:$0xff]   ;;  %v1638_v60 = vld [vmem:[#allocation5 + $0x3c4] ss:$16 sps:$4 sm:$0xff]   ;;  %v1641_v61 = vld [vmem:[#allocation5 + $0x3cc] ss:$16 sps:$4 sm:$0xff]  }
 0x10f   :  { %1129 = vmatprep.mubr.bf16.mxu0 %v265_v1  ;;  %1211 = vmatprep.mubr.bf16.mxu1 %v265_v1  ;;  %v1636_v62 = vld [vmem:[#allocation5 + $0x3c0] ss:$16 sps:$4 sm:$0xff]   ;;  %v1647_v1 = vld [vmem:[#allocation5 + $0x3ec] ss:$16 sps:$4 sm:$0xff]  }
 0x110   :  { %1099 = vmatprep.subr.bf16.mxu0 %v1560_v63  ;;  %1181 = vmatprep.subr.bf16.mxu1 %v1563_v0  ;;  %v1639_v63 = vld [vmem:[#allocation5 + $0x3c8] ss:$16 sps:$4 sm:$0xff]   ;;  %v1644_v0 = vld [vmem:[#allocation5 + $0x3e4] ss:$16 sps:$4 sm:$0xff]  }
 0x112   :  { %1100 = vmatpush1.bf16.msra.mxu0 %v1558_v2  ;;  %1182 = vmatpush1.bf16.msra.mxu1 %v1561_v3  ;;  %v1642_v2 = vld [vmem:[#allocation5 + $0x3e0] ss:$16 sps:$4 sm:$0xff]   ;;  %v1645_v3 = vld [vmem:[#allocation5 + $0x3e8] ss:$16 sps:$4 sm:$0xff]  }
 0x113   :  { %1101 = vmatprep.subr.bf16.mxu0 %v1566_v4  ;;  %1183 = vmatprep.subr.bf16.mxu1 %v1569_v5  ;;  %v260_v4 = vmax.f32 %v1822_v51, 0.0 }
 0x115   :  { %v264_v5 = vpack.c.bf16 %v260_v4, %v260_v4 }
 0x116   :  { %1102 = vmatpush1.bf16.msra.mxu0 %v1564_v6  ;;  %1184 = vmatpush1.bf16.msra.mxu1 %v1567_v7  ;;  %v1224_v6 = vld [vmem:[%s1857_s7] sm:$0xf] }
 0x117   :  { %1103 = vmatprep.subr.bf16.mxu0 %v1572_v8  ;;  %1185 = vmatprep.subr.bf16.mxu1 %v1575_v9  ;;  %v1225_v7 = vunpack.c.l.bf16 %v1224_v6  ;;  %v394_v8 = vld [vmem:[%s1856_s6] sm:$0xf] }
 0x118   :  { %v399_v9 = vrot.slane %v394_v8, %v1794_v16 }
 0x119   :  { %v1230_v51 = vrot.slane %v1225_v7, %v1794_v16 }
 0x11a   :  { %1104 = vmatpush1.bf16.msra.mxu0 %v1570_v10  ;;  %1186 = vmatpush1.bf16.msra.mxu1 %v1573_v11  ;;  %v407_v10 = vrot.slane %v394_v8, %v1798_v18  ;;  %v403_v11 = vrot.slane %v394_v8, %v240_v30 }
 0x11b   :  { %1105 = vmatprep.subr.bf16.mxu0 %v1578_v12  ;;  %1187 = vmatprep.subr.bf16.mxu1 %v1581_v14  ;;  %v1234_v12 = vrot.slane %v1225_v7, %v1798_v18  ;;  %v411_v14 = vrot.slane %v394_v8, %v248_v31  ;;  %v1242_v18 = vrot.slane %v1225_v7, %v91_v19  ;;  %v1430_v19 = vld [vmem:[#allocation2] ss:$0 sm:$0xff] }
 0x11e   :  { %1106 = vmatpush1.bf16.msra.mxu0 %v1576_v15  ;;  %1188 = vmatpush1.bf16.msra.mxu1 %v1579_v20 }
 0x11f   :  { %1107 = vmatprep.subr.bf16.mxu0 %v1584_v21  ;;  %1189 = vmatprep.subr.bf16.mxu1 %v1587_v22  ;;  %v1238_v21 = vrot.slane %v1225_v7, %v87_v17 }
 0x121   :  { %v1258_v17 = vrot.slane %v1238_v21, %v1794_v16 }
 0x122   :  { %1108 = vmatpush1.bf16.msra.mxu0 %v1582_v23  ;;  %1190 = vmatpush1.bf16.msra.mxu1 %v1585_v24  ;;  %v1250_v23 = vrot.slane %v1230_v51, %v1794_v16 }
 0x123   :  { %1109 = vmatprep.subr.bf16.mxu0 %v1590_v25  ;;  %1191 = vmatprep.subr.bf16.mxu1 %v1593_v26 }
 0x126   :  { %1110 = vmatpush1.bf16.msra.mxu0 %v1588_v27  ;;  %1192 = vmatpush1.bf16.msra.mxu1 %v1591_v28  ;;  %v1254_v28 = vrot.slane %v1234_v12, %v1794_v16 }
 0x127   :  { %1111 = vmatprep.subr.bf16.mxu0 %v1596_v29  ;;  %1193 = vmatprep.subr.bf16.mxu1 %v1599_v32 }
 0x12a   :  { %1112 = vmatpush1.bf16.msra.mxu0 %v1594_v33  ;;  %1194 = vmatpush1.bf16.msra.mxu1 %v1597_v34 }
 0x12b   :  { %1113 = vmatprep.subr.bf16.mxu0 %v1602_v35  ;;  %1195 = vmatprep.subr.bf16.mxu1 %v1605_v36 }
 0x12e   :  { %1114 = vmatpush1.bf16.msra.mxu0 %v1600_v37  ;;  %1196 = vmatpush1.bf16.msra.mxu1 %v1603_v38 }
 0x12f   :  { %1115 = vmatprep.subr.bf16.mxu0 %v1608_v39  ;;  %1197 = vmatprep.subr.bf16.mxu1 %v1611_v40  ;;  %v1262_v40 = vrot.slane %v1242_v18, %v1794_v16 }
 0x132   :  { %1116 = vmatpush1.bf16.msra.mxu0 %v1606_v41  ;;  %1198 = vmatpush1.bf16.msra.mxu1 %v1609_v42 }
 0x133   :  { %1117 = vmatprep.subr.bf16.mxu0 %v1614_v43  ;;  %1199 = vmatprep.subr.bf16.mxu1 %v1617_v44 }
 0x136   :  { %1118 = vmatpush1.bf16.msra.mxu0 %v1612_v45  ;;  %1200 = vmatpush1.bf16.msra.mxu1 %v1615_v46 }
 0x137   :  { %1119 = vmatprep.subr.bf16.mxu0 %v1620_v47  ;;  %1201 = vmatprep.subr.bf16.mxu1 %v1623_v48 }
 0x13a   :  { %1120 = vmatpush1.bf16.msra.mxu0 %v1618_v49  ;;  %1202 = vmatpush1.bf16.msra.mxu1 %v1621_v50 }
 0x13b   :  { %1121 = vmatprep.subr.bf16.mxu0 %v1626_v52  ;;  %1203 = vmatprep.subr.bf16.mxu1 %v1629_v53 }
 0x13e   :  { %1122 = vmatpush1.bf16.msra.mxu0 %v1624_v54  ;;  %1204 = vmatpush1.bf16.msra.mxu1 %v1627_v55 }
 0x13f   :  { %1123 = vmatprep.subr.bf16.mxu0 %v1632_v56  ;;  %1205 = vmatprep.subr.bf16.mxu1 %v1635_v57 }
 0x142   :  { %1124 = vmatpush1.bf16.msra.mxu0 %v1630_v58  ;;  %1206 = vmatpush1.bf16.msra.mxu1 %v1633_v59 }
 0x143   :  { %1125 = vmatprep.subr.bf16.mxu0 %v1638_v60  ;;  %1207 = vmatprep.subr.bf16.mxu1 %v1641_v61 }
 0x146   :  { %1126 = vmatpush1.bf16.msra.mxu0 %v1636_v62  ;;  %1208 = vmatpush1.bf16.msra.mxu1 %v1639_v63 }
 0x147   :  { %1127 = vmatprep.subr.bf16.mxu0 %v1644_v0  ;;  %1209 = vmatprep.subr.bf16.mxu1 %v1647_v1 }
 0x14a   :  { %1128 = vmatpush1.bf16.msra.mxu0 %v1642_v2  ;;  %1210 = vmatpush1.bf16.msra.mxu1 %v1645_v3 }
 0x14d   :  { %1130 = vmatmul.mubr.bf16.vlgmr.msra.gmra.mrb[4].mxu0 %v264_v5  ;;  %1212 = vmatmul.mubr.bf16.vlgmr.msra.gmra.mrb[4].mxu1 %v264_v5 }
 0x220   :  { %v1131_v15 = vpop.f32.mrb[4].mxu0  ;;  %v1213_v20 = vpop.f32.mrb[4].mxu1 }
 0x221   :  { %v1432_v22 = vadd.f32 %v1131_v15, %v399_v9  ;;  %v1434_v24 = vadd.f32 %v1213_v20, %v407_v10  ;;  %v1133_v25 = vpop.f32.mrb[5].mxu0  ;;  %v1215_v26 = vpop.f32.mrb[5].mxu1 }
 0x222   :  { %v1433_v27 = vadd.f32 %v1133_v25, %v403_v11  ;;  %v1435_v30 = vadd.f32 %v1215_v26, %v411_v14  ;;  %v1135_v29 = vpop.f32.mrb[6].mxu0  ;;  %v1217_v31 = vpop.f32.mrb[6].mxu1 }
 0x223   :  { %v1220_v32 = vmax.f32 %v1432_v22, 0.0  ;;  %v1136_v33 = vpop.f32.mrb[7].mxu0  ;;  %v1218_v34 = vpop.f32.mrb[7].mxu1  ;;  %v1222_v35 = vmax.f32 %v1434_v24, 0.0 }
 0x224   :  { %v1221_v36 = vmax.f32 %v1433_v27, 0.0  ;;  %v1223_v39 = vmax.f32 %v1435_v30, 0.0 }
 0x225   :  { %v1263_v37 = vmul.f32 %v1250_v23, %v1220_v32  ;;  %v1265_v41 = vmul.f32 %v1258_v17, %v1222_v35 }
 0x226   :  { %v1264_v38 = vmul.f32 %v1254_v28, %v1221_v36  ;;  %v1266_v43 = vmul.f32 %v1262_v40, %v1223_v39 }
 0x228   :  { %v1267_v42 = vadd.f32 %v1264_v38, %v1263_v37 }
 0x22a   :  { %v1268_v44 = vadd.f32 %v1267_v42, %v1265_v41 }
 0x22c   :  { %v1269_v13 = vadd.f32 %v1268_v44, %v1266_v43 }
 0x22e   :  { %1270 = vadd.xlane.f32.xlu0 %v1269_v13 }
 0x2bb   :  { %v1271_v45 = vpop.xlane.xlu0 %1270 }
 0x2bc   :  { %v1279_v46 = vadd.f32 %v1430_v19, %v1271_v45 }
 0x2be   :  { %v1431_v47 = vmul.f32 -1.442695, %v1279_v46 }
 0x2c0   :  { %1648 = vpow2.f32 %v1431_v47 }
 0x2ca   :  { %v1649_v48 = vpop.eup %1648 }
 0x2cb   :  { %v1283_v49 = vadd.f32 1.0, %v1649_v48 }
 0x2cd   :  { %1650 = vrcp.f32 %v1283_v49 }
 0x2d7   :  { %v1651_v50 = vpop.eup %1650 }
 0x2d8   :  { %1287 = vst.msk [vmem:[%s1859_s9] sm:$0xff] %vm1286_vm2, %v1651_v50 }
 0x2d9   :  { %1292 = vsyncpa [#allocation4], 1 }
 0x2da   :  { %1293 = vsyncpa [#allocation6], 1 }

</bundles_post_ra>
